<compile_context>
chip_gen: v7x
topology: tpu7x:2x2x1
jax: 0.10.0
libtpu: 0.0.40
codegen_flags: <defaults>
</compile_context>

<pallas_src>
import jax
import jax.numpy as jnp
from jax.experimental import pallas as pl
from jax.experimental.pallas import tpu as pltpu

# ---- demo configuration (small, consistent with the module) ----
D = 128          # GLU input_dimension (channels -> 128 lanes, lane-dense)
B = 2            # batch
T = 8            # sequence length

# Preferred rows per grid step once row counts grow (swept constant; measured
# tile-size data shows ~512-row tiles reach ~85% of HBM roofline). Tiny demo
# inputs collapse to a single full-extent block.
TN_PREFERRED = 512


def glu_kernel(x_ref, w_ref, b_ref, o_ref):
    d = w_ref.shape[0]
    # One packed MXU dot for both linear layers: (tn, d) @ (d, 2d) -> (tn, 2d).
    # Operands may be bf16; accumulation is forced to f32.
    z = jnp.dot(x_ref[...], w_ref[...], preferred_element_type=jnp.float32)
    z = z + b_ref[...]                          # bias add in f32
    sig = jax.nn.sigmoid(z[:, :d])              # gate half (fc1), f32 elementwise
    o_ref[...] = (sig * z[:, d:]).astype(o_ref.dtype)   # value half (fc2), cast at store


def pack_glu_params(w1, b1, w2, b2, *, operand_dtype=jnp.bfloat16):
    """Pack the two nn.Linear layers ONCE (hoisted out of the per-call path).

    w1/w2: (D, D) in (in, out) layout; b1/b2: (D,).
    Returns (w_packed (D, 2D) in `operand_dtype`, b_packed (1, 2D) in f32).
    fc1 occupies the first D output lanes (the gate), fc2 the last D (the value).
    """
    w_packed = jnp.concatenate([w1, w2], axis=1).astype(operand_dtype)
    b_packed = jnp.concatenate([b1, b2], axis=0).reshape(1, -1).astype(jnp.float32)
    return w_packed, b_packed


def _choose_tn(n):
    """Rows per grid step: <= TN_PREFERRED, multiple of 16, dividing n; else full extent."""
    if n <= TN_PREFERRED:
        return n
    for t in range(TN_PREFERRED, 15, -1):
        if n % t == 0 and t % 16 == 0:
            return t
    return n  # single full-extent block is always legal


def glu_forward(x, w_packed, b_packed, *, out_dtype=None):
    """x: (..., D) -> (..., D). w_packed (D, 2D) / b_packed (1, 2D) from pack_glu_params."""
    lead = x.shape[:-1]
    d = x.shape[-1]
    two_d = w_packed.shape[1]
    n = 1
    for s in lead:
        n *= s
    out_dtype = out_dtype or w_packed.dtype
    xf = x.reshape(n, d).astype(w_packed.dtype)   # bf16 operands -> half the HBM bytes

    tn = _choose_tn(n)

    out = pl.pallas_call(
        glu_kernel,
        out_shape=jax.ShapeDtypeStruct((n, d), out_dtype),
        grid=(n // tn,),
        in_specs=[
            pl.BlockSpec((tn, d), lambda i: (i, 0)),           # activations, tiled by rows
            pl.BlockSpec((d, two_d), lambda i: (0, 0),
                         pipeline_mode=pl.Buffered(1)),        # resident weights, single-buffered
            pl.BlockSpec((1, two_d), lambda i: (0, 0),
                         pipeline_mode=pl.Buffered(1)),        # resident bias, single-buffered
        ],
        out_specs=pl.BlockSpec((tn, d), lambda i: (i, 0)),     # lane-dense (d = 128)
        compiler_params=pltpu.CompilerParams(
            dimension_semantics=("parallel",)),                # shards steps across v7x's 2 TCs
    )(xf, w_packed, b_packed)
    return out.reshape(*lead, d)


# ---------------- pure-JAX reference (mirrors the PyTorch forward, f32) ----------------
def glu_reference(x, w1, b1, w2, b2):
    sig = jax.nn.sigmoid(x @ w1 + b1)
    lin = x @ w2 + b2
    return sig * lin


# ---------------- deterministic parameter init (PyTorch nn.Linear-like) ----------------
def init_params(key):
    bound = 1.0 / (D ** 0.5)
    k1, k2, k3, k4 = jax.random.split(key, 4)
    w1 = jax.random.uniform(k1, (D, D), jnp.float32, -bound, bound)
    b1 = jax.random.uniform(k2, (D,), jnp.float32, -bound, bound)
    w2 = jax.random.uniform(k3, (D, D), jnp.float32, -bound, bound)
    b2 = jax.random.uniform(k4, (D,), jnp.float32, -bound, bound)
    return w1, b1, w2, b2


if __name__ == "__main__":
    key = jax.random.PRNGKey(0)
    kx, kp = jax.random.split(key)
    x = jax.random.normal(kx, (B, T, D), jnp.float32)
    w1, b1, w2, b2 = init_params(kp)

    # Pack once at init (hoisted out of the forward path), reuse across calls.
    w_packed, b_packed = pack_glu_params(w1, b1, w2, b2, operand_dtype=jnp.bfloat16)

    glu_fwd = jax.jit(glu_forward)
    out = jax.block_until_ready(glu_fwd(x, w_packed, b_packed))

    ref = glu_reference(x, w1, b1, w2, b2)
    assert out.shape == (B, T, D)
    # bf16 operands + bf16 output -> ~1e-2-level relative error vs the f32 reference.
    assert jnp.allclose(out.astype(jnp.float32), ref, atol=5e-2, rtol=5e-2), \
        "mismatch vs reference"
    print("KERNEL_OK")
</pallas_src>

<mosaic_0001>
module attributes {stable_mosaic.version = 11 : i64} {
  func.func @glu_kernel(%arg0: i32, %arg1: memref<16x128xbf16, #tpu.memory_space<vmem>>, %arg2: memref<128x256xbf16, #tpu.memory_space<vmem>>, %arg3: memref<1x256xf32, #tpu.memory_space<vmem>>, %arg4: memref<16x128xbf16, #tpu.memory_space<vmem>>) attributes {dimension_semantics = [#tpu.dimension_semantics<parallel>], iteration_bounds = array<i64: 1>, scalar_prefetch = 0 : i64, scratch_operands = 0 : i64, tpu.core_type = #tpu.core_type<tc>, window_params = [{transform_indices = @transform_0, window_bounds = array<i64: 16, 128>}, {pipeline_mode = #tpu.pipeline_mode<synchronous>, transform_indices = @transform_1, window_bounds = array<i64: 128, 256>}, {pipeline_mode = #tpu.pipeline_mode<synchronous>, transform_indices = @transform_2, window_bounds = array<i64: 1, 256>}, {transform_indices = @transform_3, window_bounds = array<i64: 16, 128>}]} {
    %c0 = arith.constant 0 : index
    %c0_0 = arith.constant 0 : index
    %0 = vector.load %arg1[%c0, %c0_0] : memref<16x128xbf16, #tpu.memory_space<vmem>>, vector<16x128xbf16>
    %c0_1 = arith.constant 0 : index
    %c0_2 = arith.constant 0 : index
    %1 = vector.load %arg2[%c0_1, %c0_2] : memref<128x256xbf16, #tpu.memory_space<vmem>>, vector<128x256xbf16>
    %cst = arith.constant dense<0.000000e+00> : vector<16x256xf32>
    %2 = tpu.matmul %0, %1, %cst {dimension_numbers = #tpu.dot_dimension_numbers<[1], [0], [0], [1], [0, 0, 1, 1], [], []>} : vector<16x128xbf16>, vector<128x256xbf16>, vector<16x256xf32> -> vector<16x256xf32>
    %c0_3 = arith.constant 0 : index
    %c0_4 = arith.constant 0 : index
    %3 = vector.load %arg3[%c0_3, %c0_4] : memref<1x256xf32, #tpu.memory_space<vmem>>, vector<1x256xf32>
    %4 = vector.broadcast %3 : vector<1x256xf32> to vector<16x256xf32>
    %5 = arith.addf %2, %4 : vector<16x256xf32>
    %6 = vector.extract_strided_slice %5 {offsets = [0, 0], sizes = [16, 128], strides = [1, 1]} : vector<16x256xf32> to vector<16x128xf32>
    %7 = arith.negf %6 : vector<16x128xf32>
    %8 = math.exp %7 : vector<16x128xf32>
    %cst_5 = arith.constant 1.000000e+00 : f32
    %9 = vector.broadcast %cst_5 : f32 to vector<16x128xf32>
    %10 = arith.addf %9, %8 : vector<16x128xf32>
    %11 = arith.divf %9, %10 : vector<16x128xf32>
    %12 = vector.extract_strided_slice %5 {offsets = [0, 128], sizes = [16, 128], strides = [1, 1]} : vector<16x256xf32> to vector<16x128xf32>
    %13 = arith.mulf %11, %12 : vector<16x128xf32>
    %14 = arith.truncf %13 : vector<16x128xf32> to vector<16x128xbf16>
    %c0_6 = arith.constant 0 : index
    %c0_7 = arith.constant 0 : index
    %15 = vector.load %arg4[%c0_6, %c0_7] : memref<16x128xbf16, #tpu.memory_space<vmem>>, vector<16x128xbf16>
    tpu.vector_store %arg4[%c0_6, %c0_7], %14 {strides = array<i32>} : memref<16x128xbf16, #tpu.memory_space<vmem>>, vector<16x128xbf16>,
    return
  }
  func.func @transform_0(%arg0: i32) -> (i32, i32) {
    %c0_i32 = arith.constant 0 : i32
    %c0_i32_0 = arith.constant 0 : i32
    return %arg0, %c0_i32 : i32, i32
  }
  func.func @transform_1(%arg0: i32) -> (i32, i32) {
    %c0_i32 = arith.constant 0 : i32
    %c0_i32_0 = arith.constant 0 : i32
    %c0_i32_1 = arith.constant 0 : i32
    return %c0_i32, %c0_i32_0 : i32, i32
  }
  func.func @transform_2(%arg0: i32) -> (i32, i32) {
    %c0_i32 = arith.constant 0 : i32
    %c0_i32_0 = arith.constant 0 : i32
    %c0_i32_1 = arith.constant 0 : i32
    return %c0_i32, %c0_i32_0 : i32, i32
  }
  func.func @transform_3(%arg0: i32) -> (i32, i32) {
    %c0_i32 = arith.constant 0 : i32
    %c0_i32_0 = arith.constant 0 : i32
    return %arg0, %c0_i32 : i32, i32
  }
}

</mosaic_0001>

<bundles_post_ra>
// kernel: glu_forward.1
= control target key start
LH: loop header
LB: loop body
LE: loop exit
PB: predicated region body
PF: predicated region fallthrough
CT: control target
= control target key end

     0   :  { %8 = vsyncpa [#allocation3], 0  ;;  %s403_s0 = inlined_call_operand.vmem [shape: bf16[16,128], index: 0, kind: input, shape index: {}]   ;;  %s404_s1 = inlined_call_operand.hbm [shape: bf16[128,256], index: 1, kind: input, shape index: {}]   ;;  %s405_s2 = inlined_call_operand.vmem [shape: f32[1,256], index: 2, kind: input, shape index: {}]   ;;  %s406_s3 = inlined_call_operand.hbm [shape: bf16[16,128], index: 3, kind: output, shape index: {}]  }
   0x1   :  { %9 = vsyncpa [#allocation4], 0  ;;  %s346_s12 = smov [#allocation2]   ;;  %s298_s16 = scalar_lea.hbm %s404_s1, 2048 }
   0x2   :  { %s17_s13 = sshll.u32 %s346_s12, 4  ;;  %p299_p0 = scmp.ne.s32.totalorder %s404_s1, %s298_s16  ;;  %s18_s13 = int_to_ptr.vmem [resolvable:$true] %s17_s13 }
   0x3   :  { %p302_p1 = scmp.lt.u32.totalorder %s298_s16, %s404_s1 }
   0x5   :  { %p304_p2 = pnand %p302_p1, %p299_p0 }
   0x7   :  { %307 = shalt.err (!%p304_p2)
}
   0x8   :  { %s308_s21 = scalar_lea.vmem %s18_s13, 2048  ;;  %p313_p4 = scmp.lt.s32.totalorder %s18_s13, %s18_s13 }
   0x9   :  { %p309_p3 = scmp.ne.s32.totalorder %s18_s13, %s308_s21  ;;  %p314_p5 = scmp.lt.s32.totalorder %s308_s21, %s308_s21 }
   0xb   :  { %p315_p6 = por %p314_p5, %p313_p4 }
   0xd   :  { %p316_p7 = pnand %p315_p6, %p309_p3 }
   0xf   :  { %319 = shalt.err (!%p316_p7)
}
  0x10   :  { %s347_s22 = smov 128   ;;  %s348_s23 = smov 8  }
  0x11   :  { %23 = dma.hbm_to_vmem [thread:$0]  %s404_s1, 2048, %s18_s13, [#allocation3], %s347_s22, %s347_s22, %s348_s23  }
  0x12   :  { %342 = dma.done.wait [#allocation3], 2048  }
  0x13   :  { %343 = vsyncadd [#allocation3], 4294965248  ;;  %v349_v0 = vmov 0   ;;  %v265_v1 = vld [vmem:[#allocation2 + $0x4] ss:$8 sps:$4 sm:$0xff]   ;;  %v50_v18 = vlaneseq }
  0x14   :  { %178 = vmatprep.mubr.bf16.mxu0 %v349_v0  ;;  %v267_v2 = vld [vmem:[#allocation2] ss:$8 sps:$4 sm:$0xff]   ;;  %146 = vmatprep.subr.bf16.mxu0 %v265_v1  ;;  %v268_v3 = vld [vmem:[#allocation2 + $0x14] ss:$8 sps:$4 sm:$0xff]   ;;  %v270_v4 = vld [vmem:[#allocation2 + $0x10] ss:$8 sps:$4 sm:$0xff]  }
  0x15   :  { %147 = vmatpush1.bf16.msra.mxu0 %v267_v2  ;;  %v271_v5 = vld [vmem:[#allocation2 + $0x24] ss:$8 sps:$4 sm:$0xff]   ;;  %v273_v6 = vld [vmem:[#allocation2 + $0x20] ss:$8 sps:$4 sm:$0xff]   ;;  %v274_v7 = vld [vmem:[#allocation2 + $0x34] ss:$8 sps:$4 sm:$0xff]  }
  0x16   :  { %148 = vmatprep.subr.bf16.mxu0 %v268_v3  ;;  %v276_v8 = vld [vmem:[#allocation2 + $0x30] ss:$8 sps:$4 sm:$0xff]   ;;  %v277_v9 = vld [vmem:[#allocation2 + $0x44] ss:$8 sps:$4 sm:$0xff]   ;;  %v279_v10 = vld [vmem:[#allocation2 + $0x40] ss:$8 sps:$4 sm:$0xff]  }
  0x17   :  { %v280_v11 = vld [vmem:[#allocation2 + $0x54] ss:$8 sps:$4 sm:$0xff]   ;;  %v282_v12 = vld [vmem:[#allocation2 + $0x50] ss:$8 sps:$4 sm:$0xff]   ;;  %v283_v13 = vld [vmem:[#allocation2 + $0x64] ss:$8 sps:$4 sm:$0xff]  }
  0x18   :  { %v285_v14 = vld [vmem:[#allocation2 + $0x60] ss:$8 sps:$4 sm:$0xff]   ;;  %v286_v15 = vld [vmem:[#allocation2 + $0x74] ss:$8 sps:$4 sm:$0xff]   ;;  %v288_v16 = vld [vmem:[#allocation2 + $0x70] ss:$8 sps:$4 sm:$0xff]  }
  0x19   :  { %149 = vmatpush1.bf16.msra.mxu0 %v270_v4  ;;  %v289_v17 = vld [vmem:[%s403_s0] sm:$0xff]   ;;  %v51_v19 = vshrl.u32 %v50_v18, 7  ;;  %s350_s0 = smov [#allocation5]  }
  0x1a   :  { %150 = vmatprep.subr.bf16.mxu0 %v271_v5  ;;  %v48_v21 = vld [vmem:[%s405_s2] sm:$0x3]  ;;  %s218_s2 = sshll.u32 %s350_s0, 4  ;;  %s219_s2 = int_to_ptr.vmem [resolvable:$true] %s218_s2 }
  0x1b   :  { %v52_v20 = vsub.s32 0, %v51_v19  ;;  %v56_v35 = vsub.s32 1, %v51_v19  ;;  %s320_s29 = scalar_lea.vmem %s219_s2, 128  ;;  %p325_p9 = scmp.lt.s32.totalorder %s219_s2, %s219_s2 }
  0x1c   :  { %p321_p8 = scmp.ne.s32.totalorder %s219_s2, %s320_s29  ;;  %p326_p10 = scmp.lt.s32.totalorder %s320_s29, %s320_s29 }
  0x1d   :  { %151 = vmatpush1.bf16.msra.mxu0 %v273_v6  ;;  %v53_v22 = vrot.slane %v48_v21, %v52_v20  ;;  %v57_v36 = vrot.slane %v48_v21, %v56_v35 }
  0x1e   :  { %152 = vmatprep.subr.bf16.mxu0 %v274_v7  ;;  %p327_p11 = por %p326_p10, %p325_p9 }
  0x20   :  { %p328_p12 = pnand %p327_p11, %p321_p8 }
  0x21   :  { %153 = vmatpush1.bf16.msra.mxu0 %v276_v8 }
  0x22   :  { %154 = vmatprep.subr.bf16.mxu0 %v277_v9 }
  0x25   :  { %155 = vmatpush1.bf16.msra.mxu0 %v279_v10 }
  0x26   :  { %156 = vmatprep.subr.bf16.mxu0 %v280_v11 }
  0x29   :  { %157 = vmatpush1.bf16.msra.mxu0 %v282_v12 }
  0x2a   :  { %158 = vmatprep.subr.bf16.mxu0 %v283_v13 }
  0x2d   :  { %159 = vmatpush1.bf16.msra.mxu0 %v285_v14 }
  0x2e   :  { %160 = vmatprep.subr.bf16.mxu0 %v286_v15 }
  0x31   :  { %161 = vmatpush1.bf16.msra.mxu0 %v288_v16 }
  0x34   :  { %179 = vmatmul.mubr.bf16.vlgmr.msra.gmra.mrb[0].mxu0 %v289_v17 }
 0x107   :  { %v180_v23 = vpop.f32.mrb[0].mxu0 }
 0x108   :  { %v181_v24 = vadd.f32 %v180_v23, %v53_v22  ;;  %v182_v25 = vpop.f32.mrb[1].mxu0 }
 0x109   :  { %v184_v26 = vpop.f32.mrb[2].mxu0  ;;  %v183_v37 = vadd.f32 %v182_v25, %v57_v36 }
 0x10a   :  { %v247_v27 = vmul.f32 -1.442695, %v181_v24  ;;  %v185_v28 = vadd.f32 %v184_v26, %v53_v22  ;;  %v186_v29 = vpop.f32.mrb[3].mxu0 }
 0x10b   :  { %v187_v40 = vadd.f32 %v186_v29, %v57_v36 }
 0x10c   :  { %290 = vpow2.f32 %v247_v27  ;;  %v248_v30 = vmul.f32 -1.442695, %v185_v28 }
 0x10e   :  { %292 = vpow2.f32 %v248_v30 }
 0x116   :  { %v291_v31 = vpop.eup %290 }
 0x117   :  { %v195_v32 = vadd.f32 1.0, %v291_v31 }
 0x118   :  { %v293_v33 = vpop.eup %292 }
 0x119   :  { %294 = vrcp.f32 %v195_v32  ;;  %v196_v34 = vadd.f32 1.0, %v293_v33 }
 0x11b   :  { %296 = vrcp.f32 %v196_v34 }
 0x123   :  { %v295_v38 = vpop.eup %294 }
 0x124   :  { %v201_v39 = vmul.f32 %v295_v38, %v183_v37 }
 0x125   :  { %v297_v41 = vpop.eup %296 }
 0x126   :  { %v202_v42 = vmul.f32 %v297_v41, %v187_v40 }
 0x128   :  { %v256_v43 = vpack.c.bf16 %v202_v42, %v201_v39 }
 0x12a   :  { %257 = vst [vmem:[#allocation5] sm:$0xff] %v256_v43  }
 0x12b   :  { %331 = shalt.err (!%p328_p12)
}
 0x12c   :  { %s332_s5 = scalar_lea.hbm %s406_s3, 128 }
 0x12d   :  { %p333_p13 = scmp.ne.s32.totalorder %s406_s3, %s332_s5  ;;  %p336_p0 = scmp.lt.u32.totalorder %s332_s5, %s406_s3 }
 0x12f   :  { %p338_p1 = pnand %p336_p0, %p333_p13 }
 0x131   :  { %341 = shalt.err (!%p338_p1)
}
 0x132   :  { %s351_s10 = smov 64   ;;  %s352_s11 = smov 4  }
 0x133   :  { %224 = dma.vmem_to_hbm [thread:$0]  %s219_s2, 128, %s406_s3, [#allocation4], %s351_s10, %s351_s10, %s352_s11  }
 0x134   :  { %344 = dma.done.wait [#allocation4], 128  }
 0x135   :  { %345 = vsyncadd [#allocation4], 4294967168 }
 0x136   :  { %228 = vsyncpa [#allocation3], 1 }
 0x137   :  { %229 = vsyncpa [#allocation4], 1 }

</bundles_post_ra>
